<compile_context>
chip_gen: v7x
topology: tpu7x:2x2x1
jax: 0.10.0
libtpu: 0.0.40
codegen_flags: <defaults>
</compile_context>

<pallas_src>
import functools

import jax
import jax.numpy as jnp
from jax.experimental import pallas as pl
from jax.experimental.pallas import tpu as pltpu

_LANES = 128
_MAX_BLOCK_ROWS = 8192          # caps f32 intermediates per block (~4 MiB)


def _detect_chip():
    """Best-effort chip detection; safe fallbacks everywhere."""
    kind = ""
    try:
        dev = jax.devices()[0]
        kind = (getattr(dev, "device_kind", "") or "").lower()
    except Exception:
        pass
    is_v7 = "v7" in kind
    num_tc = 2 if is_v7 else 1          # v5e / v6e have 1 TensorCore per chip
    target_block_bytes = (4 << 20) if is_v7 else (2 << 20)
    return num_tc, target_block_bytes


_NUM_TC, _TARGET_BLOCK_BYTES = _detect_chip()


def _psnr_ssd_kernel(x_ref, y_ref, o_ref, *, block_rows, blocks_per_split,
                     total_rows, needs_mask, fold):
    """Accumulate per-split sum-of-squared-differences into an (8,128) tile."""
    s = pl.program_id(0)   # split ("parallel"; one per TensorCore on v7x)
    j = pl.program_id(1)   # row-block within split ("arbitrary")

    @pl.when(j == 0)
    def _():
        o_ref[...] = jnp.zeros_like(o_ref)

    xv = x_ref[...].astype(jnp.float32)
    yv = y_ref[...].astype(jnp.float32)
    d = xv - yv
    sq = d * d

    def _reduce_and_accumulate(vals):
        if fold > 1:
            # 4 interleaved accumulators -> dependent vadd chain is 4x shorter,
            # keeping the VPU off the critical path on high-bandwidth chips.
            p = vals.reshape(block_rows // (8 * fold), fold, 8, _LANES)
            partial = p.sum(axis=0).sum(axis=0)
        else:
            partial = vals.reshape(block_rows // 8, 8, _LANES).sum(axis=0)
        o_ref[...] += partial[None, :, :]

    if needs_mask:
        # Logical (unclamped) starting row of this block.
        row0 = (s * blocks_per_split + j) * block_rows
        is_edge = row0 + block_rows > total_rows   # partial OR clamped-dup block

        @pl.when(jnp.logical_not(is_edge))
        def _():
            _reduce_and_accumulate(sq)

        @pl.when(is_edge)
        def _():
            row_ids = row0 + jax.lax.broadcasted_iota(jnp.int32, sq.shape, 0)
            _reduce_and_accumulate(jnp.where(row_ids < total_rows, sq, 0.0))
    else:
        _reduce_and_accumulate(sq)


@jax.jit
def _psnr_device(x, y):
    """Full device-side PSNR: one XLA launch, returns a scalar."""
    total = int(x.size)

    xf = jnp.ravel(x)   # contiguous reshape: no HBM copy
    yf = jnp.ravel(y)

    main = (total // _LANES) * _LANES
    rows = main // _LANES

    if rows < 8:
        # Tiny input (< 1 KiB of lanes): a kernel launch is not worth it.
        d = xf.astype(jnp.float32) - yf.astype(jnp.float32)
        mse = jnp.sum(d * d) / jnp.float32(total)
        return 10.0 * jnp.log10(1.0 / mse)

    if main != total:
        # Sub-128-element ragged tail: summed with a tiny plain-JAX op.
        xt = xf[main:].astype(jnp.float32)
        yt = yf[main:].astype(jnp.float32)
        tail_ssd = jnp.sum((xt - yt) ** 2)
        # TODO(synk): the prefix slice still materializes an N-element copy
        # when total % 128 != 0; true zero-copy needs a manual 1-D DMA from an
        # ANY-space ref.  Only matters for non-multiple-of-128 sizes.
        x_main = xf[:main]
        y_main = yf[:main]
    else:
        tail_ssd = jnp.float32(0.0)
        x_main = xf
        y_main = yf

    x2d = x_main.reshape(rows, _LANES)   # native dtype; cast happens in-kernel
    y2d = y_main.reshape(rows, _LANES)

    # dtype-aware block sizing: target ~_TARGET_BLOCK_BYTES of NATIVE bytes
    # per input per block, capped to keep f32 intermediates small.
    itemsize = int(jnp.dtype(x.dtype).itemsize)
    target_rows = max(8, _TARGET_BLOCK_BYTES // (_LANES * itemsize))
    target_rows = min(target_rows, _MAX_BLOCK_ROWS)
    block_rows = min(target_rows, (rows // 8) * 8)      # multiple of 8

    n_blocks = (rows + block_rows - 1) // block_rows
    n_splits = _NUM_TC if n_blocks >= _NUM_TC else 1
    bps = (n_blocks + n_splits - 1) // n_splits          # blocks per split
    last_block = n_blocks - 1

    # Masking only needed if some grid point maps to a block extending past
    # the real rows (partial last block or clamped duplicate block).
    needs_mask = (rows % block_rows != 0) or (n_splits * bps != n_blocks)
    fold = 4 if block_rows % 32 == 0 else 1

    def in_index(s, j):
        # Clamp so the block index is always in range; out-of-range work is
        # fully masked inside the kernel, so no double counting.
        return (jnp.minimum(s * bps + j, last_block), 0)

    kernel = functools.partial(
        _psnr_ssd_kernel,
        block_rows=block_rows,
        blocks_per_split=bps,
        total_rows=rows,
        needs_mask=needs_mask,
        fold=fold,
    )

    partials = pl.pallas_call(
        kernel,
        out_shape=jax.ShapeDtypeStruct((n_splits, 8, _LANES), jnp.float32),
        grid_spec=pltpu.PrefetchScalarGridSpec(
            num_scalar_prefetch=0,
            grid=(n_splits, bps),
            in_specs=[
                pl.BlockSpec((block_rows, _LANES), in_index),
                pl.BlockSpec((block_rows, _LANES), in_index),
            ],
            out_specs=pl.BlockSpec((1, 8, _LANES), lambda s, j: (s, 0, 0)),
        ),
        compiler_params=pltpu.CompilerParams(
            # "parallel" shards the split axis across TensorCores on v7x and
            # is a no-op on single-TC chips (where n_splits == 1 anyway).
            dimension_semantics=("parallel", "arbitrary"),
            vmem_limit_bytes=48 * 1024 * 1024,
        ),
    )(x2d, y2d)

    # Final scalar math (one cross-lane reduce of a tiny buffer + log10); this
    # is also where the per-TensorCore partials get combined.
    ssd = jnp.sum(partials, dtype=jnp.float32) + tail_ssd
    mse = ssd / jnp.float32(total)
    return 10.0 * jnp.log10(1.0 / mse)


def psnr(x, y):
    """PSNR between two arrays of identical shape (peak = 1.0). Returns float."""
    assert x.shape == y.shape, "x and y must have the same shape"
    return float(_psnr_device(x, y))   # matches torch .item()


if __name__ == "__main__":
    key = jax.random.PRNGKey(0)
    kx, kn = jax.random.split(key)
    # Small image-like inputs (NCHW), values in [0, 1] as PSNR assumes peak=1.0.
    x = jax.random.uniform(kx, (2, 4, 16, 16), dtype=jnp.float32)
    noise = 0.05 * jax.random.normal(kn, (2, 4, 16, 16), dtype=jnp.float32)
    y = jnp.clip(x + noise, 0.0, 1.0)

    result = psnr(x, y)
    jax.block_until_ready(jnp.asarray(result))

    # Pure-JAX reference check.
    mse_ref = jnp.mean((x - y) ** 2)
    psnr_ref = float(10.0 * jnp.log10(1.0 / mse_ref))
    assert abs(result - psnr_ref) < 1e-3 * max(1.0, abs(psnr_ref)), (result, psnr_ref)

    print("KERNEL_OK")
</pallas_src>

<mosaic_0001>
module attributes {stable_mosaic.version = 11 : i64} {
  func.func @_psnr_ssd_kernel(%arg0: i32, %arg1: i32, %arg2: memref<16x128xf32, #tpu.memory_space<vmem>>, %arg3: memref<16x128xf32, #tpu.memory_space<vmem>>, %arg4: memref<1x8x128xf32, #tpu.memory_space<vmem>>) attributes {dimension_semantics = [#tpu.dimension_semantics<parallel>, #tpu.dimension_semantics<arbitrary>], iteration_bounds = array<i64: 1, 1>, scalar_prefetch = 0 : i64, scratch_operands = 0 : i64, tpu.core_type = #tpu.core_type<tc>, window_params = [{transform_indices = @transform_0, window_bounds = array<i64: 16, 128>}, {transform_indices = @transform_1, window_bounds = array<i64: 16, 128>}, {transform_indices = @transform_2, window_bounds = array<i64: 1, 8, 128>}]} {
    %c0_i32 = arith.constant 0 : i32
    %0 = arith.cmpi eq, %arg1, %c0_i32 : i32
    %1 = arith.extui %0 : i1 to i32
    %c0_i32_0 = arith.constant 0 : i32
    %2 = arith.cmpi ne, %1, %c0_i32_0 : i32
    scf.if %2 {
      %cst_10 = arith.constant 0.000000e+00 : f32
      %13 = vector.broadcast %cst_10 : f32 to vector<1x8x128xf32>
      %c0_11 = arith.constant 0 : index
      %c0_12 = arith.constant 0 : index
      %c0_13 = arith.constant 0 : index
      %14 = vector.load %arg4[%c0_11, %c0_12, %c0_13] : memref<1x8x128xf32, #tpu.memory_space<vmem>>, vector<1x8x128xf32>
      tpu.vector_store %arg4[%c0_11, %c0_12, %c0_13], %13 {strides = array<i32>} : memref<1x8x128xf32, #tpu.memory_space<vmem>>, vector<1x8x128xf32>,
    } else {
    }
    %c0 = arith.constant 0 : index
    %c0_1 = arith.constant 0 : index
    %3 = vector.load %arg2[%c0, %c0_1] : memref<16x128xf32, #tpu.memory_space<vmem>>, vector<16x128xf32>
    %c0_2 = arith.constant 0 : index
    %c0_3 = arith.constant 0 : index
    %4 = vector.load %arg3[%c0_2, %c0_3] : memref<16x128xf32, #tpu.memory_space<vmem>>, vector<16x128xf32>
    %5 = arith.subf %3, %4 : vector<16x128xf32>
    %6 = arith.mulf %5, %5 : vector<16x128xf32>
    %7 = vector.shape_cast %6 : vector<16x128xf32> to vector<2x8x128xf32>
    %cst = arith.constant dense<0.000000e+00> : vector<8x128xf32>
    %8 = vector.multi_reduction <add>, %7, %cst [0] : vector<2x8x128xf32> to vector<8x128xf32>
    %c0_4 = arith.constant 0 : index
    %c0_5 = arith.constant 0 : index
    %c0_6 = arith.constant 0 : index
    %9 = vector.load %arg4[%c0_4, %c0_5, %c0_6] : memref<1x8x128xf32, #tpu.memory_space<vmem>>, vector<1x8x128xf32>
    %10 = vector.shape_cast %8 : vector<8x128xf32> to vector<1x8x128xf32>
    %11 = arith.addf %9, %10 : vector<1x8x128xf32>
    %c0_7 = arith.constant 0 : index
    %c0_8 = arith.constant 0 : index
    %c0_9 = arith.constant 0 : index
    %12 = vector.load %arg4[%c0_7, %c0_8, %c0_9] : memref<1x8x128xf32, #tpu.memory_space<vmem>>, vector<1x8x128xf32>
    tpu.vector_store %arg4[%c0_7, %c0_8, %c0_9], %11 {strides = array<i32>} : memref<1x8x128xf32, #tpu.memory_space<vmem>>, vector<1x8x128xf32>,
    return
  }
  func.func @transform_0(%arg0: i32, %arg1: i32) -> (i32, i32) {
    %c1_i32 = arith.constant 1 : i32
    %0 = arith.muli %arg0, %c1_i32 : i32
    %1 = arith.addi %0, %arg1 : i32
    %c0_i32 = arith.constant 0 : i32
    %2 = arith.minsi %1, %c0_i32 : i32
    %c0_i32_0 = arith.constant 0 : i32
    %c0_i32_1 = arith.constant 0 : i32
    return %2, %c0_i32_0 : i32, i32
  }
  func.func @transform_1(%arg0: i32, %arg1: i32) -> (i32, i32) {
    %c1_i32 = arith.constant 1 : i32
    %0 = arith.muli %arg0, %c1_i32 : i32
    %1 = arith.addi %0, %arg1 : i32
    %c0_i32 = arith.constant 0 : i32
    %2 = arith.minsi %1, %c0_i32 : i32
    %c0_i32_0 = arith.constant 0 : i32
    %c0_i32_1 = arith.constant 0 : i32
    return %2, %c0_i32_0 : i32, i32
  }
  func.func @transform_2(%arg0: i32, %arg1: i32) -> (i32, i32, i32) {
    %c0_i32 = arith.constant 0 : i32
    %c0_i32_0 = arith.constant 0 : i32
    %c0_i32_1 = arith.constant 0 : i32
    return %arg0, %c0_i32, %c0_i32_0 : i32, i32, i32
  }
}

</mosaic_0001>

<bundles_post_ra>
// kernel: _psnr_device.1
= control target key start
LH: loop header
LB: loop body
LE: loop exit
PB: predicated region body
PF: predicated region fallthrough
CT: control target
= control target key end

     0   :  { %s139_s0 = inlined_call_operand.vmem [shape: f32[16,128], index: 0, kind: input, shape index: {}]   ;;  %s140_s1 = inlined_call_operand.vmem [shape: f32[16,128], index: 1, kind: input, shape index: {}]   ;;  %s141_s2 = inlined_call_operand.vmem [shape: f32[1,8,128], index: 2, kind: output, shape index: {}]  }
   0x1   :  { %v80_v0 = vld [vmem:[%s139_s0] sm:$0xff]  ;;  %v81_v1 = vld [vmem:[%s139_s0 + $0x8] sm:$0xff] }
   0x2   :  { %v82_v2 = vld [vmem:[%s140_s1] sm:$0xff]  ;;  %v83_v3 = vld [vmem:[%s140_s1 + $0x8] sm:$0xff] }
   0x3   :  { %v84_v4 = vsub.f32 %v80_v0, %v82_v2  ;;  %v85_v5 = vsub.f32 %v81_v1, %v83_v3 }
   0x5   :  { %v86_v6 = vmul.f32 %v84_v4, %v84_v4  ;;  %v87_v7 = vmul.f32 %v85_v5, %v85_v5 }
   0x7   :  { %v88_v8 = vadd.f32 %v87_v7, %v86_v6 }
   0x9   :  { %91 = vst [vmem:[%s141_s2] sm:$0xff] %v88_v8 }

</bundles_post_ra>
